<compile_context>
chip_gen: v7x
topology: tpu7x:2x2x1
jax: 0.10.0
libtpu: 0.0.40
codegen_flags: <defaults>
</compile_context>

<pallas_src>
import jax
import jax.numpy as jnp
from jax.experimental import pallas as pl
from jax.experimental.pallas import tpu as pltpu


# Packed-parameter layout (weights stored row-major as (out, in)):
_W1_OFF, _B1_OFF = 0, 35      # w1: 5x7 , b1: 5
_W2_OFF, _B2_OFF = 40, 55     # w2: 3x5 , b2: 3
_W3_OFF, _B3_OFF = 58, 61     # w3: 1x3 , b3: 1
_N_PARAMS = 62

_SUB = 16                     # sublanes per inner-loop step (2 vregs deep)
_UNIT = _SUB * 128            # batch elements per inner-loop step
_TB_DEFAULT = 262144          # batch elements per grid step (16 MiB dbl-buffered)
_TB_MAX = 524288              # keep 2*(28+4)*tb <= 32 MiB for v7x's 64 MiB VMEM


def titanic_kernel(params_ref, x_ref, o_ref):
    """params_ref: (62,) f32 in SMEM.  x_ref: (7, S, 128) f32.  o_ref: (S, 128) f32."""
    # ---- Hoist all 62 loop-invariant SMEM scalar reads out of the loop ------
    w1 = [[params_ref[_W1_OFF + o * 7 + k] for k in range(7)] for o in range(5)]
    b1 = [params_ref[_B1_OFF + o] for o in range(5)]
    w2 = [[params_ref[_W2_OFF + o * 5 + k] for k in range(5)] for o in range(3)]
    b2 = [params_ref[_B2_OFF + o] for o in range(3)]
    w3 = [params_ref[_W3_OFF + k] for k in range(3)]
    b3 = params_ref[_B3_OFF]

    n_sub = x_ref.shape[1] // _SUB        # static sub-chunk count

    @pl.loop(0, n_sub)
    def _(j):
        s0 = pl.multiple_of(j * _SUB, _SUB)
        x = x_ref[:, pl.ds(s0, _SUB), :]  # (7, 16, 128) -- 14 full vregs

        # ---- Linear(7, 5) + ReLU : unrolled VPU broadcast multiply-adds -----
        h1 = []
        for o in range(5):
            z = w1[o][0] * x[0]
            for k in range(1, 7):
                z = z + w1[o][k] * x[k]
            h1.append(jnp.maximum(z + b1[o], 0.0))

        # ---- Linear(5, 3) + ReLU ---------------------------------------------
        h2 = []
        for o in range(3):
            z = w2[o][0] * h1[0]
            for k in range(1, 5):
                z = z + w2[o][k] * h1[k]
            h2.append(jnp.maximum(z + b2[o], 0.0))

        # ---- Linear(3, 1) + Sigmoid (EUP) --------------------------------------
        z = w3[0] * h2[0] + w3[1] * h2[1] + w3[2] * h2[2] + b3
        o_ref[pl.ds(s0, _SUB), :] = jax.nn.sigmoid(z)   # lane-dense full-vreg store


def _pack_params(params):
    w1, b1, w2, b2, w3, b3 = params       # w stored (in, out), b stored (1, out)
    packed = jnp.concatenate([
        w1.T.reshape(-1), b1.reshape(-1),
        w2.T.reshape(-1), b2.reshape(-1),
        w3.T.reshape(-1), b3.reshape(-1),
    ]).astype(jnp.float32)
    assert packed.shape[0] == _N_PARAMS
    return packed


def titanic_forward_fm(x_fm, params, *, tb=_TB_DEFAULT):
    """Primary entry point.  x_fm: FEATURE-MAJOR (7, B) f32 -> (B, 1) f32.

    Feature-major input means the kernel reads the array as-is: no extra
    transpose pass over HBM.  If B is a multiple of 2048 the wrapper is
    copy-free (reshapes are contiguous splits).
    """
    F, B = x_fm.shape
    assert F == 7, "TitanicNetwork expects 7 input features"
    packed = _pack_params(params)

    # --- Tile-size selection ---------------------------------------------------
    tb = max(_UNIT, min(int(tb), _TB_MAX))
    b_pad_min = pl.cdiv(B, _UNIT) * _UNIT
    n_tiles = pl.cdiv(b_pad_min, tb)
    if n_tiles == 1 and b_pad_min >= 2 * _UNIT:
        n_tiles = 2                                    # let v7x megacore shard the grid
    tb = pl.cdiv(b_pad_min, n_tiles * _UNIT) * _UNIT   # rebalance -> minimal padding
    b_pad = n_tiles * tb
    s_blk = tb // 128

    x_fm = x_fm.astype(jnp.float32)
    if b_pad != B:                                     # only raggeds pay a pad pass
        x_fm = jnp.pad(x_fm, ((0, 0), (0, b_pad - B)))
    x3 = x_fm.reshape(7, b_pad // 128, 128)            # contiguous split: free

    # --- VMEM budget: raise v5e's 16 MiB default, stay under v7x's 64 MiB ------
    in_bytes = 7 * s_blk * 128 * 4
    out_bytes = s_blk * 128 * 4
    vmem_limit = int(min(48 << 20, max(32 << 20, 2 * (in_bytes + out_bytes) + (8 << 20))))

    out = pl.pallas_call(
        titanic_kernel,
        out_shape=jax.ShapeDtypeStruct((b_pad // 128, 128), jnp.float32),
        grid=(n_tiles,),
        in_specs=[
            pl.BlockSpec(memory_space=pltpu.MemorySpace.SMEM),      # packed params
            pl.BlockSpec((7, s_blk, 128), lambda i: (0, i, 0)),     # batch tile
        ],
        out_specs=pl.BlockSpec((s_blk, 128), lambda i: (i, 0)),
        compiler_params=pltpu.CompilerParams(
            dimension_semantics=("parallel",),                      # megacore sharding
            vmem_limit_bytes=vmem_limit),
    )(packed, x3)

    out = out.reshape(b_pad)
    if b_pad != B:
        out = out[:B]
    return out[:, None]                                 # (B, 1)


def titanic_forward(x, params, *, tb=_TB_DEFAULT):
    """PyTorch-layout convenience wrapper.  x: (B, 7) f32 -> (B, 1) f32.

    Pays one extra HBM pass for the (B,7)->(7,B) relayout; prefer producing
    feature-major data upstream and calling `titanic_forward_fm` directly.
    """
    assert x.shape[1] == 7, "TitanicNetwork expects 7 input features"
    return titanic_forward_fm(x.T, params, tb=tb)


def init_params(key):
    """Mimics nn.Linear's U(-1/sqrt(fan_in), 1/sqrt(fan_in)) init."""
    def linear(key, fan_in, fan_out):
        k_w, k_b = jax.random.split(key)
        bound = 1.0 / jnp.sqrt(fan_in)
        w = jax.random.uniform(k_w, (fan_in, fan_out), jnp.float32, -bound, bound)
        b = jax.random.uniform(k_b, (1, fan_out), jnp.float32, -bound, bound)
        return w, b

    k1, k2, k3 = jax.random.split(key, 3)
    w1, b1 = linear(k1, 7, 5)
    w2, b2 = linear(k2, 5, 3)
    w3, b3 = linear(k3, 3, 1)
    return (w1, b1, w2, b2, w3, b3)


if __name__ == "__main__":
    key = jax.random.PRNGKey(0)
    k_params, k_x1, k_x2 = jax.random.split(key, 3)

    params = init_params(k_params)
    w1, b1, w2, b2, w3, b3 = params

    def ref_fwd(xb):   # plain-JAX reference, standard (B, 7) layout
        return jax.nn.sigmoid(
            jnp.maximum(jnp.maximum(xb @ w1 + b1, 0.0) @ w2 + b2, 0.0) @ w3 + b3)

    # --- Primary path: feature-major input, 2 grid tiles x 2 inner sub-chunks ---
    B1 = 8192
    x_fm = jax.random.normal(k_x1, (7, B1), dtype=jnp.float32)
    out1 = jax.block_until_ready(titanic_forward_fm(x_fm, params, tb=4096))
    assert out1.shape == (B1, 1)
    assert jnp.allclose(out1, ref_fwd(x_fm.T), atol=2e-5), "feature-major mismatch"

    # --- Convenience path: PyTorch-style (B, 7), ragged batch (padding path) ----
    B2 = 3000
    x_bm = jax.random.normal(k_x2, (B2, 7), dtype=jnp.float32)
    out2 = jax.block_until_ready(titanic_forward(x_bm, params))
    assert out2.shape == (B2, 1)
    assert jnp.allclose(out2, ref_fwd(x_bm), atol=2e-5), "batch-major mismatch"

    print("KERNEL_OK")
</pallas_src>

<mosaic_0001>
module attributes {stable_mosaic.version = 11 : i64} {
  func.func @titanic_kernel(%arg0: i32, %arg1: memref<62xf32, #tpu.memory_space<smem>>, %arg2: memref<7x32x128xf32, #tpu.memory_space<vmem>>, %arg3: memref<32x128xf32, #tpu.memory_space<vmem>>) attributes {dimension_semantics = [#tpu.dimension_semantics<parallel>], iteration_bounds = array<i64: 2>, scalar_prefetch = 0 : i64, scratch_operands = 0 : i64, tpu.core_type = #tpu.core_type<tc>, window_params = [{transform_indices = @transform_0, window_bounds = array<i64: 62>}, {transform_indices = @transform_1, window_bounds = array<i64: 7, 32, 128>}, {transform_indices = @transform_2, window_bounds = array<i64: 32, 128>}]} {
    %c0 = arith.constant 0 : index
    %0 = memref.load %arg1[%c0] : memref<62xf32, #tpu.memory_space<smem>>
    %c1 = arith.constant 1 : index
    %1 = memref.load %arg1[%c1] : memref<62xf32, #tpu.memory_space<smem>>
    %c2 = arith.constant 2 : index
    %2 = memref.load %arg1[%c2] : memref<62xf32, #tpu.memory_space<smem>>
    %c3 = arith.constant 3 : index
    %3 = memref.load %arg1[%c3] : memref<62xf32, #tpu.memory_space<smem>>
    %c4 = arith.constant 4 : index
    %4 = memref.load %arg1[%c4] : memref<62xf32, #tpu.memory_space<smem>>
    %c5 = arith.constant 5 : index
    %5 = memref.load %arg1[%c5] : memref<62xf32, #tpu.memory_space<smem>>
    %c6 = arith.constant 6 : index
    %6 = memref.load %arg1[%c6] : memref<62xf32, #tpu.memory_space<smem>>
    %c7 = arith.constant 7 : index
    %7 = memref.load %arg1[%c7] : memref<62xf32, #tpu.memory_space<smem>>
    %c8 = arith.constant 8 : index
    %8 = memref.load %arg1[%c8] : memref<62xf32, #tpu.memory_space<smem>>
    %c9 = arith.constant 9 : index
    %9 = memref.load %arg1[%c9] : memref<62xf32, #tpu.memory_space<smem>>
    %c10 = arith.constant 10 : index
    %10 = memref.load %arg1[%c10] : memref<62xf32, #tpu.memory_space<smem>>
    %c11 = arith.constant 11 : index
    %11 = memref.load %arg1[%c11] : memref<62xf32, #tpu.memory_space<smem>>
    %c12 = arith.constant 12 : index
    %12 = memref.load %arg1[%c12] : memref<62xf32, #tpu.memory_space<smem>>
    %c13 = arith.constant 13 : index
    %13 = memref.load %arg1[%c13] : memref<62xf32, #tpu.memory_space<smem>>
    %c14 = arith.constant 14 : index
    %14 = memref.load %arg1[%c14] : memref<62xf32, #tpu.memory_space<smem>>
    %c15 = arith.constant 15 : index
    %15 = memref.load %arg1[%c15] : memref<62xf32, #tpu.memory_space<smem>>
    %c16 = arith.constant 16 : index
    %16 = memref.load %arg1[%c16] : memref<62xf32, #tpu.memory_space<smem>>
    %c17 = arith.constant 17 : index
    %17 = memref.load %arg1[%c17] : memref<62xf32, #tpu.memory_space<smem>>
    %c18 = arith.constant 18 : index
    %18 = memref.load %arg1[%c18] : memref<62xf32, #tpu.memory_space<smem>>
    %c19 = arith.constant 19 : index
    %19 = memref.load %arg1[%c19] : memref<62xf32, #tpu.memory_space<smem>>
    %c20 = arith.constant 20 : index
    %20 = memref.load %arg1[%c20] : memref<62xf32, #tpu.memory_space<smem>>
    %c21 = arith.constant 21 : index
    %21 = memref.load %arg1[%c21] : memref<62xf32, #tpu.memory_space<smem>>
    %c22 = arith.constant 22 : index
    %22 = memref.load %arg1[%c22] : memref<62xf32, #tpu.memory_space<smem>>
    %c23 = arith.constant 23 : index
    %23 = memref.load %arg1[%c23] : memref<62xf32, #tpu.memory_space<smem>>
    %c24 = arith.constant 24 : index
    %24 = memref.load %arg1[%c24] : memref<62xf32, #tpu.memory_space<smem>>
    %c25 = arith.constant 25 : index
    %25 = memref.load %arg1[%c25] : memref<62xf32, #tpu.memory_space<smem>>
    %c26 = arith.constant 26 : index
    %26 = memref.load %arg1[%c26] : memref<62xf32, #tpu.memory_space<smem>>
    %c27 = arith.constant 27 : index
    %27 = memref.load %arg1[%c27] : memref<62xf32, #tpu.memory_space<smem>>
    %c28 = arith.constant 28 : index
    %28 = memref.load %arg1[%c28] : memref<62xf32, #tpu.memory_space<smem>>
    %c29 = arith.constant 29 : index
    %29 = memref.load %arg1[%c29] : memref<62xf32, #tpu.memory_space<smem>>
    %c30 = arith.constant 30 : index
    %30 = memref.load %arg1[%c30] : memref<62xf32, #tpu.memory_space<smem>>
    %c31 = arith.constant 31 : index
    %31 = memref.load %arg1[%c31] : memref<62xf32, #tpu.memory_space<smem>>
    %c32 = arith.constant 32 : index
    %32 = memref.load %arg1[%c32] : memref<62xf32, #tpu.memory_space<smem>>
    %c33 = arith.constant 33 : index
    %33 = memref.load %arg1[%c33] : memref<62xf32, #tpu.memory_space<smem>>
    %c34 = arith.constant 34 : index
    %34 = memref.load %arg1[%c34] : memref<62xf32, #tpu.memory_space<smem>>
    %c35 = arith.constant 35 : index
    %35 = memref.load %arg1[%c35] : memref<62xf32, #tpu.memory_space<smem>>
    %c36 = arith.constant 36 : index
    %36 = memref.load %arg1[%c36] : memref<62xf32, #tpu.memory_space<smem>>
    %c37 = arith.constant 37 : index
    %37 = memref.load %arg1[%c37] : memref<62xf32, #tpu.memory_space<smem>>
    %c38 = arith.constant 38 : index
    %38 = memref.load %arg1[%c38] : memref<62xf32, #tpu.memory_space<smem>>
    %c39 = arith.constant 39 : index
    %39 = memref.load %arg1[%c39] : memref<62xf32, #tpu.memory_space<smem>>
    %c40 = arith.constant 40 : index
    %40 = memref.load %arg1[%c40] : memref<62xf32, #tpu.memory_space<smem>>
    %c41 = arith.constant 41 : index
    %41 = memref.load %arg1[%c41] : memref<62xf32, #tpu.memory_space<smem>>
    %c42 = arith.constant 42 : index
    %42 = memref.load %arg1[%c42] : memref<62xf32, #tpu.memory_space<smem>>
    %c43 = arith.constant 43 : index
    %43 = memref.load %arg1[%c43] : memref<62xf32, #tpu.memory_space<smem>>
    %c44 = arith.constant 44 : index
    %44 = memref.load %arg1[%c44] : memref<62xf32, #tpu.memory_space<smem>>
    %c45 = arith.constant 45 : index
    %45 = memref.load %arg1[%c45] : memref<62xf32, #tpu.memory_space<smem>>
    %c46 = arith.constant 46 : index
    %46 = memref.load %arg1[%c46] : memref<62xf32, #tpu.memory_space<smem>>
    %c47 = arith.constant 47 : index
    %47 = memref.load %arg1[%c47] : memref<62xf32, #tpu.memory_space<smem>>
    %c48 = arith.constant 48 : index
    %48 = memref.load %arg1[%c48] : memref<62xf32, #tpu.memory_space<smem>>
    %c49 = arith.constant 49 : index
    %49 = memref.load %arg1[%c49] : memref<62xf32, #tpu.memory_space<smem>>
    %c50 = arith.constant 50 : index
    %50 = memref.load %arg1[%c50] : memref<62xf32, #tpu.memory_space<smem>>
    %c51 = arith.constant 51 : index
    %51 = memref.load %arg1[%c51] : memref<62xf32, #tpu.memory_space<smem>>
    %c52 = arith.constant 52 : index
    %52 = memref.load %arg1[%c52] : memref<62xf32, #tpu.memory_space<smem>>
    %c53 = arith.constant 53 : index
    %53 = memref.load %arg1[%c53] : memref<62xf32, #tpu.memory_space<smem>>
    %c54 = arith.constant 54 : index
    %54 = memref.load %arg1[%c54] : memref<62xf32, #tpu.memory_space<smem>>
    %c55 = arith.constant 55 : index
    %55 = memref.load %arg1[%c55] : memref<62xf32, #tpu.memory_space<smem>>
    %c56 = arith.constant 56 : index
    %56 = memref.load %arg1[%c56] : memref<62xf32, #tpu.memory_space<smem>>
    %c57 = arith.constant 57 : index
    %57 = memref.load %arg1[%c57] : memref<62xf32, #tpu.memory_space<smem>>
    %c58 = arith.constant 58 : index
    %58 = memref.load %arg1[%c58] : memref<62xf32, #tpu.memory_space<smem>>
    %c59 = arith.constant 59 : index
    %59 = memref.load %arg1[%c59] : memref<62xf32, #tpu.memory_space<smem>>
    %c60 = arith.constant 60 : index
    %60 = memref.load %arg1[%c60] : memref<62xf32, #tpu.memory_space<smem>>
    %c61 = arith.constant 61 : index
    %61 = memref.load %arg1[%c61] : memref<62xf32, #tpu.memory_space<smem>>
    %c0_i32 = arith.constant 0 : i32
    %c2_i32 = arith.constant 2 : i32
    %62 = arith.addi %c0_i32, %c2_i32 : i32
    %c1_i32 = arith.constant 1 : i32
    scf.for %arg4 = %c0_i32 to %62 step %c1_i32  : i32 {
      %c1_i32_1 = arith.constant 1 : i32
      %63 = arith.muli %arg4, %c1_i32_1 : i32
      %c0_i32_2 = arith.constant 0 : i32
      %64 = arith.addi %c0_i32_2, %63 : i32
      %c16_i32 = arith.constant 16 : i32
      %65 = arith.muli %64, %c16_i32 : i32
      %66 = tpu.assume_multiple %65, 16 : i32
      %c0_3 = arith.constant 0 : index
      %67 = arith.index_cast %66 : i32 to index
      %c0_4 = arith.constant 0 : index
      %68 = vector.load %arg2[%c0_3, %67, %c0_4] : memref<7x32x128xf32, #tpu.memory_space<vmem>>, vector<7x16x128xf32>
      %69 = vector.extract_strided_slice %68 {offsets = [0, 0, 0], sizes = [1, 16, 128], strides = [1, 1, 1]} : vector<7x16x128xf32> to vector<1x16x128xf32>
      %70 = vector.shape_cast %69 : vector<1x16x128xf32> to vector<16x128xf32>
      %71 = vector.broadcast %0 : f32 to vector<16x128xf32>
      %72 = arith.mulf %71, %70 : vector<16x128xf32>
      %73 = vector.extract_strided_slice %68 {offsets = [1, 0, 0], sizes = [1, 16, 128], strides = [1, 1, 1]} : vector<7x16x128xf32> to vector<1x16x128xf32>
      %74 = vector.shape_cast %73 : vector<1x16x128xf32> to vector<16x128xf32>
      %75 = vector.broadcast %1 : f32 to vector<16x128xf32>
      %76 = arith.mulf %75, %74 : vector<16x128xf32>
      %77 = arith.addf %72, %76 : vector<16x128xf32>
      %78 = vector.extract_strided_slice %68 {offsets = [2, 0, 0], sizes = [1, 16, 128], strides = [1, 1, 1]} : vector<7x16x128xf32> to vector<1x16x128xf32>
      %79 = vector.shape_cast %78 : vector<1x16x128xf32> to vector<16x128xf32>
      %80 = vector.broadcast %2 : f32 to vector<16x128xf32>
      %81 = arith.mulf %80, %79 : vector<16x128xf32>
      %82 = arith.addf %77, %81 : vector<16x128xf32>
      %83 = vector.extract_strided_slice %68 {offsets = [3, 0, 0], sizes = [1, 16, 128], strides = [1, 1, 1]} : vector<7x16x128xf32> to vector<1x16x128xf32>
      %84 = vector.shape_cast %83 : vector<1x16x128xf32> to vector<16x128xf32>
      %85 = vector.broadcast %3 : f32 to vector<16x128xf32>
      %86 = arith.mulf %85, %84 : vector<16x128xf32>
      %87 = arith.addf %82, %86 : vector<16x128xf32>
      %88 = vector.extract_strided_slice %68 {offsets = [4, 0, 0], sizes = [1, 16, 128], strides = [1, 1, 1]} : vector<7x16x128xf32> to vector<1x16x128xf32>
      %89 = vector.shape_cast %88 : vector<1x16x128xf32> to vector<16x128xf32>
      %90 = vector.broadcast %4 : f32 to vector<16x128xf32>
      %91 = arith.mulf %90, %89 : vector<16x128xf32>
      %92 = arith.addf %87, %91 : vector<16x128xf32>
      %93 = vector.extract_strided_slice %68 {offsets = [5, 0, 0], sizes = [1, 16, 128], strides = [1, 1, 1]} : vector<7x16x128xf32> to vector<1x16x128xf32>
      %94 = vector.shape_cast %93 : vector<1x16x128xf32> to vector<16x128xf32>
      %95 = vector.broadcast %5 : f32 to vector<16x128xf32>
      %96 = arith.mulf %95, %94 : vector<16x128xf32>
      %97 = arith.addf %92, %96 : vector<16x128xf32>
      %98 = vector.extract_strided_slice %68 {offsets = [6, 0, 0], sizes = [1, 16, 128], strides = [1, 1, 1]} : vector<7x16x128xf32> to vector<1x16x128xf32>
      %99 = vector.shape_cast %98 : vector<1x16x128xf32> to vector<16x128xf32>
      %100 = vector.broadcast %6 : f32 to vector<16x128xf32>
      %101 = arith.mulf %100, %99 : vector<16x128xf32>
      %102 = arith.addf %97, %101 : vector<16x128xf32>
      %103 = vector.broadcast %35 : f32 to vector<16x128xf32>
      %104 = arith.addf %102, %103 : vector<16x128xf32>
      %cst = arith.constant 0.000000e+00 : f32
      %105 = vector.broadcast %cst : f32 to vector<16x128xf32>
      %106 = arith.maximumf %104, %105 : vector<16x128xf32>
      %107 = vector.extract_strided_slice %68 {offsets = [0, 0, 0], sizes = [1, 16, 128], strides = [1, 1, 1]} : vector<7x16x128xf32> to vector<1x16x128xf32>
      %108 = vector.shape_cast %107 : vector<1x16x128xf32> to vector<16x128xf32>
      %109 = vector.broadcast %7 : f32 to vector<16x128xf32>
      %110 = arith.mulf %109, %108 : vector<16x128xf32>
      %111 = vector.extract_strided_slice %68 {offsets = [1, 0, 0], sizes = [1, 16, 128], strides = [1, 1, 1]} : vector<7x16x128xf32> to vector<1x16x128xf32>
      %112 = vector.shape_cast %111 : vector<1x16x128xf32> to vector<16x128xf32>
      %113 = vector.broadcast %8 : f32 to vector<16x128xf32>
      %114 = arith.mulf %113, %112 : vector<16x128xf32>
      %115 = arith.addf %110, %114 : vector<16x128xf32>
      %116 = vector.extract_strided_slice %68 {offsets = [2, 0, 0], sizes = [1, 16, 128], strides = [1, 1, 1]} : vector<7x16x128xf32> to vector<1x16x128xf32>
      %117 = vector.shape_cast %116 : vector<1x16x128xf32> to vector<16x128xf32>
      %118 = vector.broadcast %9 : f32 to vector<16x128xf32>
      %119 = arith.mulf %118, %117 : vector<16x128xf32>
      %120 = arith.addf %115, %119 : vector<16x128xf32>
      %121 = vector.extract_strided_slice %68 {offsets = [3, 0, 0], sizes = [1, 16, 128], strides = [1, 1, 1]} : vector<7x16x128xf32> to vector<1x16x128xf32>
      %122 = vector.shape_cast %121 : vector<1x16x128xf32> to vector<16x128xf32>
      %123 = vector.broadcast %10 : f32 to vector<16x128xf32>
      %124 = arith.mulf %123, %122 : vector<16x128xf32>
      %125 = arith.addf %120, %124 : vector<16x128xf32>
      %126 = vector.extract_strided_slice %68 {offsets = [4, 0, 0], sizes = [1, 16, 128], strides = [1, 1, 1]} : vector<7x16x128xf32> to vector<1x16x128xf32>
      %127 = vector.shape_cast %126 : vector<1x16x128xf32> to vector<16x128xf32>
      %128 = vector.broadcast %11 : f32 to vector<16x128xf32>
      %129 = arith.mulf %128, %127 : vector<16x128xf32>
      %130 = arith.addf %125, %129 : vector<16x128xf32>
      %131 = vector.extract_strided_slice %68 {offsets = [5, 0, 0], sizes = [1, 16, 128], strides = [1, 1, 1]} : vector<7x16x128xf32> to vector<1x16x128xf32>
      %132 = vector.shape_cast %131 : vector<1x16x128xf32> to vector<16x128xf32>
      %133 = vector.broadcast %12 : f32 to vector<16x128xf32>
      %134 = arith.mulf %133, %132 : vector<16x128xf32>
      %135 = arith.addf %130, %134 : vector<16x128xf32>
      %136 = vector.extract_strided_slice %68 {offsets = [6, 0, 0], sizes = [1, 16, 128], strides = [1, 1, 1]} : vector<7x16x128xf32> to vector<1x16x128xf32>
      %137 = vector.shape_cast %136 : vector<1x16x128xf32> to vector<16x128xf32>
      %138 = vector.broadcast %13 : f32 to vector<16x128xf32>
      %139 = arith.mulf %138, %137 : vector<16x128xf32>
      %140 = arith.addf %135, %139 : vector<16x128xf32>
      %141 = vector.broadcast %36 : f32 to vector<16x128xf32>
      %142 = arith.addf %140, %141 : vector<16x128xf32>
      %cst_5 = arith.constant 0.000000e+00 : f32
      %143 = vector.broadcast %cst_5 : f32 to vector<16x128xf32>
      %144 = arith.maximumf %142, %143 : vector<16x128xf32>
      %145 = vector.extract_strided_slice %68 {offsets = [0, 0, 0], sizes = [1, 16, 128], strides = [1, 1, 1]} : vector<7x16x128xf32> to vector<1x16x128xf32>
      %146 = vector.shape_cast %145 : vector<1x16x128xf32> to vector<16x128xf32>
      %147 = vector.broadcast %14 : f32 to vector<16x128xf32>
      %148 = arith.mulf %147, %146 : vector<16x128xf32>
      %149 = vector.extract_strided_slice %68 {offsets = [1, 0, 0], sizes = [1, 16, 128], strides = [1, 1, 1]} : vector<7x16x128xf32> to vector<1x16x128xf32>
      %150 = vector.shape_cast %149 : vector<1x16x128xf32> to vector<16x128xf32>
      %151 = vector.broadcast %15 : f32 to vector<16x128xf32>
      %152 = arith.mulf %151, %150 : vector<16x128xf32>
      %153 = arith.addf %148, %152 : vector<16x128xf32>
      %154 = vector.extract_strided_slice %68 {offsets = [2, 0, 0], sizes = [1, 16, 128], strides = [1, 1, 1]} : vector<7x16x128xf32> to vector<1x16x128xf32>
      %155 = vector.shape_cast %154 : vector<1x16x128xf32> to vector<16x128xf32>
      %156 = vector.broadcast %16 : f32 to vector<16x128xf32>
      %157 = arith.mulf %156, %155 : vector<16x128xf32>
      %158 = arith.addf %153, %157 : vector<16x128xf32>
      %159 = vector.extract_strided_slice %68 {offsets = [3, 0, 0], sizes = [1, 16, 128], strides = [1, 1, 1]} : vector<7x16x128xf32> to vector<1x16x128xf32>
      %160 = vector.shape_cast %159 : vector<1x16x128xf32> to vector<16x128xf32>
      %161 = vector.broadcast %17 : f32 to vector<16x128xf32>
      %162 = arith.mulf %161, %160 : vector<16x128xf32>
      %163 = arith.addf %158, %162 : vector<16x128xf32>
      %164 = vector.extract_strided_slice %68 {offsets = [4, 0, 0], sizes = [1, 16, 128], strides = [1, 1, 1]} : vector<7x16x128xf32> to vector<1x16x128xf32>
      %165 = vector.shape_cast %164 : vector<1x16x128xf32> to vector<16x128xf32>
      %166 = vector.broadcast %18 : f32 to vector<16x128xf32>
      %167 = arith.mulf %166, %165 : vector<16x128xf32>
      %168 = arith.addf %163, %167 : vector<16x128xf32>
      %169 = vector.extract_strided_slice %68 {offsets = [5, 0, 0], sizes = [1, 16, 128], strides = [1, 1, 1]} : vector<7x16x128xf32> to vector<1x16x128xf32>
      %170 = vector.shape_cast %169 : vector<1x16x128xf32> to vector<16x128xf32>
      %171 = vector.broadcast %19 : f32 to vector<16x128xf32>
      %172 = arith.mulf %171, %170 : vector<16x128xf32>
      %173 = arith.addf %168, %172 : vector<16x128xf32>
      %174 = vector.extract_strided_slice %68 {offsets = [6, 0, 0], sizes = [1, 16, 128], strides = [1, 1, 1]} : vector<7x16x128xf32> to vector<1x16x128xf32>
      %175 = vector.shape_cast %174 : vector<1x16x128xf32> to vector<16x128xf32>
      %176 = vector.broadcast %20 : f32 to vector<16x128xf32>
      %177 = arith.mulf %176, %175 : vector<16x128xf32>
      %178 = arith.addf %173, %177 : vector<16x128xf32>
      %179 = vector.broadcast %37 : f32 to vector<16x128xf32>
      %180 = arith.addf %178, %179 : vector<16x128xf32>
      %cst_6 = arith.constant 0.000000e+00 : f32
      %181 = vector.broadcast %cst_6 : f32 to vector<16x128xf32>
      %182 = arith.maximumf %180, %181 : vector<16x128xf32>
      %183 = vector.extract_strided_slice %68 {offsets = [0, 0, 0], sizes = [1, 16, 128], strides = [1, 1, 1]} : vector<7x16x128xf32> to vector<1x16x128xf32>
      %184 = vector.shape_cast %183 : vector<1x16x128xf32> to vector<16x128xf32>
      %185 = vector.broadcast %21 : f32 to vector<16x128xf32>
      %186 = arith.mulf %185, %184 : vector<16x128xf32>
      %187 = vector.extract_strided_slice %68 {offsets = [1, 0, 0], sizes = [1, 16, 128], strides = [1, 1, 1]} : vector<7x16x128xf32> to vector<1x16x128xf32>
      %188 = vector.shape_cast %187 : vector<1x16x128xf32> to vector<16x128xf32>
      %189 = vector.broadcast %22 : f32 to vector<16x128xf32>
      %190 = arith.mulf %189, %188 : vector<16x128xf32>
      %191 = arith.addf %186, %190 : vector<16x128xf32>
      %192 = vector.extract_strided_slice %68 {offsets = [2, 0, 0], sizes = [1, 16, 128], strides = [1, 1, 1]} : vector<7x16x128xf32> to vector<1x16x128xf32>
      %193 = vector.shape_cast %192 : vector<1x16x128xf32> to vector<16x128xf32>
      %194 = vector.broadcast %23 : f32 to vector<16x128xf32>
      %195 = arith.mulf %194, %193 : vector<16x128xf32>
      %196 = arith.addf %191, %195 : vector<16x128xf32>
      %197 = vector.extract_strided_slice %68 {offsets = [3, 0, 0], sizes = [1, 16, 128], strides = [1, 1, 1]} : vector<7x16x128xf32> to vector<1x16x128xf32>
      %198 = vector.shape_cast %197 : vector<1x16x128xf32> to vector<16x128xf32>
      %199 = vector.broadcast %24 : f32 to vector<16x128xf32>
      %200 = arith.mulf %199, %198 : vector<16x128xf32>
      %201 = arith.addf %196, %200 : vector<16x128xf32>
      %202 = vector.extract_strided_slice %68 {offsets = [4, 0, 0], sizes = [1, 16, 128], strides = [1, 1, 1]} : vector<7x16x128xf32> to vector<1x16x128xf32>
      %203 = vector.shape_cast %202 : vector<1x16x128xf32> to vector<16x128xf32>
      %204 = vector.broadcast %25 : f32 to vector<16x128xf32>
      %205 = arith.mulf %204, %203 : vector<16x128xf32>
      %206 = arith.addf %201, %205 : vector<16x128xf32>
      %207 = vector.extract_strided_slice %68 {offsets = [5, 0, 0], sizes = [1, 16, 128], strides = [1, 1, 1]} : vector<7x16x128xf32> to vector<1x16x128xf32>
      %208 = vector.shape_cast %207 : vector<1x16x128xf32> to vector<16x128xf32>
      %209 = vector.broadcast %26 : f32 to vector<16x128xf32>
      %210 = arith.mulf %209, %208 : vector<16x128xf32>
      %211 = arith.addf %206, %210 : vector<16x128xf32>
      %212 = vector.extract_strided_slice %68 {offsets = [6, 0, 0], sizes = [1, 16, 128], strides = [1, 1, 1]} : vector<7x16x128xf32> to vector<1x16x128xf32>
      %213 = vector.shape_cast %212 : vector<1x16x128xf32> to vector<16x128xf32>
      %214 = vector.broadcast %27 : f32 to vector<16x128xf32>
      %215 = arith.mulf %214, %213 : vector<16x128xf32>
      %216 = arith.addf %211, %215 : vector<16x128xf32>
      %217 = vector.broadcast %38 : f32 to vector<16x128xf32>
      %218 = arith.addf %216, %217 : vector<16x128xf32>
      %cst_7 = arith.constant 0.000000e+00 : f32
      %219 = vector.broadcast %cst_7 : f32 to vector<16x128xf32>
      %220 = arith.maximumf %218, %219 : vector<16x128xf32>
      %221 = vector.extract_strided_slice %68 {offsets = [0, 0, 0], sizes = [1, 16, 128], strides = [1, 1, 1]} : vector<7x16x128xf32> to vector<1x16x128xf32>
      %222 = vector.shape_cast %221 : vector<1x16x128xf32> to vector<16x128xf32>
      %223 = vector.broadcast %28 : f32 to vector<16x128xf32>
      %224 = arith.mulf %223, %222 : vector<16x128xf32>
      %225 = vector.extract_strided_slice %68 {offsets = [1, 0, 0], sizes = [1, 16, 128], strides = [1, 1, 1]} : vector<7x16x128xf32> to vector<1x16x128xf32>
      %226 = vector.shape_cast %225 : vector<1x16x128xf32> to vector<16x128xf32>
      %227 = vector.broadcast %29 : f32 to vector<16x128xf32>
      %228 = arith.mulf %227, %226 : vector<16x128xf32>
      %229 = arith.addf %224, %228 : vector<16x128xf32>
      %230 = vector.extract_strided_slice %68 {offsets = [2, 0, 0], sizes = [1, 16, 128], strides = [1, 1, 1]} : vector<7x16x128xf32> to vector<1x16x128xf32>
      %231 = vector.shape_cast %230 : vector<1x16x128xf32> to vector<16x128xf32>
      %232 = vector.broadcast %30 : f32 to vector<16x128xf32>
      %233 = arith.mulf %232, %231 : vector<16x128xf32>
      %234 = arith.addf %229, %233 : vector<16x128xf32>
      %235 = vector.extract_strided_slice %68 {offsets = [3, 0, 0], sizes = [1, 16, 128], strides = [1, 1, 1]} : vector<7x16x128xf32> to vector<1x16x128xf32>
      %236 = vector.shape_cast %235 : vector<1x16x128xf32> to vector<16x128xf32>
      %237 = vector.broadcast %31 : f32 to vector<16x128xf32>
      %238 = arith.mulf %237, %236 : vector<16x128xf32>
      %239 = arith.addf %234, %238 : vector<16x128xf32>
      %240 = vector.extract_strided_slice %68 {offsets = [4, 0, 0], sizes = [1, 16, 128], strides = [1, 1, 1]} : vector<7x16x128xf32> to vector<1x16x128xf32>
      %241 = vector.shape_cast %240 : vector<1x16x128xf32> to vector<16x128xf32>
      %242 = vector.broadcast %32 : f32 to vector<16x128xf32>
      %243 = arith.mulf %242, %241 : vector<16x128xf32>
      %244 = arith.addf %239, %243 : vector<16x128xf32>
      %245 = vector.extract_strided_slice %68 {offsets = [5, 0, 0], sizes = [1, 16, 128], strides = [1, 1, 1]} : vector<7x16x128xf32> to vector<1x16x128xf32>
      %246 = vector.shape_cast %245 : vector<1x16x128xf32> to vector<16x128xf32>
      %247 = vector.broadcast %33 : f32 to vector<16x128xf32>
      %248 = arith.mulf %247, %246 : vector<16x128xf32>
      %249 = arith.addf %244, %248 : vector<16x128xf32>
      %250 = vector.extract_strided_slice %68 {offsets = [6, 0, 0], sizes = [1, 16, 128], strides = [1, 1, 1]} : vector<7x16x128xf32> to vector<1x16x128xf32>
      %251 = vector.shape_cast %250 : vector<1x16x128xf32> to vector<16x128xf32>
      %252 = vector.broadcast %34 : f32 to vector<16x128xf32>
      %253 = arith.mulf %252, %251 : vector<16x128xf32>
      %254 = arith.addf %249, %253 : vector<16x128xf32>
      %255 = vector.broadcast %39 : f32 to vector<16x128xf32>
      %256 = arith.addf %254, %255 : vector<16x128xf32>
      %cst_8 = arith.constant 0.000000e+00 : f32
      %257 = vector.broadcast %cst_8 : f32 to vector<16x128xf32>
      %258 = arith.maximumf %256, %257 : vector<16x128xf32>
      %259 = vector.broadcast %40 : f32 to vector<16x128xf32>
      %260 = arith.mulf %259, %106 : vector<16x128xf32>
      %261 = vector.broadcast %41 : f32 to vector<16x128xf32>
      %262 = arith.mulf %261, %144 : vector<16x128xf32>
      %263 = arith.addf %260, %262 : vector<16x128xf32>
      %264 = vector.broadcast %42 : f32 to vector<16x128xf32>
      %265 = arith.mulf %264, %182 : vector<16x128xf32>
      %266 = arith.addf %263, %265 : vector<16x128xf32>
      %267 = vector.broadcast %43 : f32 to vector<16x128xf32>
      %268 = arith.mulf %267, %220 : vector<16x128xf32>
      %269 = arith.addf %266, %268 : vector<16x128xf32>
      %270 = vector.broadcast %44 : f32 to vector<16x128xf32>
      %271 = arith.mulf %270, %258 : vector<16x128xf32>
      %272 = arith.addf %269, %271 : vector<16x128xf32>
      %273 = vector.broadcast %55 : f32 to vector<16x128xf32>
      %274 = arith.addf %272, %273 : vector<16x128xf32>
      %cst_9 = arith.constant 0.000000e+00 : f32
      %275 = vector.broadcast %cst_9 : f32 to vector<16x128xf32>
      %276 = arith.maximumf %274, %275 : vector<16x128xf32>
      %277 = vector.broadcast %45 : f32 to vector<16x128xf32>
      %278 = arith.mulf %277, %106 : vector<16x128xf32>
      %279 = vector.broadcast %46 : f32 to vector<16x128xf32>
      %280 = arith.mulf %279, %144 : vector<16x128xf32>
      %281 = arith.addf %278, %280 : vector<16x128xf32>
      %282 = vector.broadcast %47 : f32 to vector<16x128xf32>
      %283 = arith.mulf %282, %182 : vector<16x128xf32>
      %284 = arith.addf %281, %283 : vector<16x128xf32>
      %285 = vector.broadcast %48 : f32 to vector<16x128xf32>
      %286 = arith.mulf %285, %220 : vector<16x128xf32>
      %287 = arith.addf %284, %286 : vector<16x128xf32>
      %288 = vector.broadcast %49 : f32 to vector<16x128xf32>
      %289 = arith.mulf %288, %258 : vector<16x128xf32>
      %290 = arith.addf %287, %289 : vector<16x128xf32>
      %291 = vector.broadcast %56 : f32 to vector<16x128xf32>
      %292 = arith.addf %290, %291 : vector<16x128xf32>
      %cst_10 = arith.constant 0.000000e+00 : f32
      %293 = vector.broadcast %cst_10 : f32 to vector<16x128xf32>
      %294 = arith.maximumf %292, %293 : vector<16x128xf32>
      %295 = vector.broadcast %50 : f32 to vector<16x128xf32>
      %296 = arith.mulf %295, %106 : vector<16x128xf32>
      %297 = vector.broadcast %51 : f32 to vector<16x128xf32>
      %298 = arith.mulf %297, %144 : vector<16x128xf32>
      %299 = arith.addf %296, %298 : vector<16x128xf32>
      %300 = vector.broadcast %52 : f32 to vector<16x128xf32>
      %301 = arith.mulf %300, %182 : vector<16x128xf32>
      %302 = arith.addf %299, %301 : vector<16x128xf32>
      %303 = vector.broadcast %53 : f32 to vector<16x128xf32>
      %304 = arith.mulf %303, %220 : vector<16x128xf32>
      %305 = arith.addf %302, %304 : vector<16x128xf32>
      %306 = vector.broadcast %54 : f32 to vector<16x128xf32>
      %307 = arith.mulf %306, %258 : vector<16x128xf32>
      %308 = arith.addf %305, %307 : vector<16x128xf32>
      %309 = vector.broadcast %57 : f32 to vector<16x128xf32>
      %310 = arith.addf %308, %309 : vector<16x128xf32>
      %cst_11 = arith.constant 0.000000e+00 : f32
      %311 = vector.broadcast %cst_11 : f32 to vector<16x128xf32>
      %312 = arith.maximumf %310, %311 : vector<16x128xf32>
      %313 = vector.broadcast %58 : f32 to vector<16x128xf32>
      %314 = arith.mulf %313, %276 : vector<16x128xf32>
      %315 = vector.broadcast %59 : f32 to vector<16x128xf32>
      %316 = arith.mulf %315, %294 : vector<16x128xf32>
      %317 = arith.addf %314, %316 : vector<16x128xf32>
      %318 = vector.broadcast %60 : f32 to vector<16x128xf32>
      %319 = arith.mulf %318, %312 : vector<16x128xf32>
      %320 = arith.addf %317, %319 : vector<16x128xf32>
      %321 = vector.broadcast %61 : f32 to vector<16x128xf32>
      %322 = arith.addf %320, %321 : vector<16x128xf32>
      %323 = arith.negf %322 : vector<16x128xf32>
      %324 = math.exp %323 : vector<16x128xf32>
      %cst_12 = arith.constant 1.000000e+00 : f32
      %325 = vector.broadcast %cst_12 : f32 to vector<16x128xf32>
      %326 = arith.addf %325, %324 : vector<16x128xf32>
      %327 = arith.divf %325, %326 : vector<16x128xf32>
      %328 = arith.index_cast %66 : i32 to index
      %c0_13 = arith.constant 0 : index
      %329 = vector.load %arg3[%328, %c0_13] : memref<32x128xf32, #tpu.memory_space<vmem>>, vector<16x128xf32>
      tpu.vector_store %arg3[%328, %c0_13], %327 {strides = array<i32>} : memref<32x128xf32, #tpu.memory_space<vmem>>, vector<16x128xf32>,
    }
    %c2_i32_0 = arith.constant 2 : i32
    return
  }
  func.func @transform_0(%arg0: i32) -> i32 {
    %c0_i32 = arith.constant 0 : i32
    %c0_i32_0 = arith.constant 0 : i32
    return %c0_i32 : i32
  }
  func.func @transform_1(%arg0: i32) -> (i32, i32, i32) {
    %c0_i32 = arith.constant 0 : i32
    %c0_i32_0 = arith.constant 0 : i32
    %c0_i32_1 = arith.constant 0 : i32
    return %c0_i32, %arg0, %c0_i32_0 : i32, i32, i32
  }
  func.func @transform_2(%arg0: i32) -> (i32, i32) {
    %c0_i32 = arith.constant 0 : i32
    %c0_i32_0 = arith.constant 0 : i32
    return %arg0, %c0_i32 : i32, i32
  }
}

</mosaic_0001>

<bundles_post_ra>
// kernel: tpu_custom_call.1
= control target key start
LH: loop header
LB: loop body
LE: loop exit
PB: predicated region body
PF: predicated region fallthrough
CT: control target
= control target key end

     0   :  { %s1523_s0 = inlined_call_operand.hbm [shape: f32[62], index: 0, kind: input, shape index: {}]   ;;  %s1524_s1 = inlined_call_operand.hbm [shape: f32[7,64,128], index: 1, kind: input, shape index: {}]   ;;  %s1525_s2 = inlined_call_operand.hbm [shape: f32[64,128], index: 2, kind: output, shape index: {}]  }
   0x1   :  { %1541 = sst [smem:[#allocation67_spill]] %s1523_s0 }
   0x2   :  { %1542 = sst [smem:[#allocation68_spill]] %s1524_s1 }
   0x3   :  { %1543 = sst [smem:[#allocation69_spill]] %s1525_s2 }
   0x4   :  { %7 = vsyncpa [#allocation5], 0 }
   0x5   :  { %8 = vsyncpa [#allocation3], 0 }
   0x6   :  { %10 = vsyncpa [#allocation3 + $0x1], 0 }
   0x7   :  { %11 = vsyncpa [#allocation4], 0 }
   0x8   :  { %13 = vsyncpa [#allocation4 + $0x1], 0  ;;  %s983_s9 = smov 0   ;;  %s985_s10 = smov 0  }
   0x9   :  { %s987_s11 = smov 0   ;;  %s989_s12 = smov 0  }
   0xa LB: > { %1544 = sst [smem:[#allocation14_spill]] %s940_s9  ;;  %s1004_s13 = sadd.s32 4294967295, %s952_s12   ;;  %s952_s12 = sphi %s989_s12, %s1656_s12   ;;  %s948_s11 = sphi %s987_s11, %s1659_s11   ;;  %s944_s10 = sphi %s985_s10, %s1658_s10   ;;  %s940_s9 = sphi %s983_s9, %s1657_s9  }
   0xb   : > { %1545 = sst [smem:[#allocation15_spill]] %s944_s10  ;;  %s698_s14 = sadd.s32 4294967294, %s952_s12  }
   0xc   : > { %1546 = sst [smem:[#allocation16_spill]] %s948_s11  ;;  %s1008_s15 = sadd.s32 1, %s952_s12  }
   0xd   : > { %1547 = sst [smem:[#allocation17_spill]] %s952_s12  ;;  %s47_s16 = sadd.s32 1, %s948_s11 }
   0xe   : > { %1548 = sst [smem:[#allocation18_spill]] %s1004_s13  ;;  %s44_s17 = ssub.s32 %s952_s12, %s1008_s15 }
   0xf   : > { %1549 = sst [smem:[#allocation19_spill]] %s1008_s15  ;;  %p54_p0 = scmp.ne.s32.totalorder %s948_s11, %s944_s10 }
  0x10   : > { %p45_p1 = scmp.eq.s32.totalorder %s44_s17, 0  ;;  %p55_p2 = scmp.eq.s32.totalorder %s952_s12, 0 }
  0x11   : > { %p60_p3 = scmp.ne.s32.totalorder %s944_s10, %s940_s9  ;;  %p61_p4 = scmp.eq.s32.totalorder %s1004_s13, 0 }
  0x12   : > { %s1020_s18 = scalar_select %p45_p1, %s948_s11, %s47_s16  }
  0x13   : > { %p1022_p5 = por %p55_p2, %p54_p0  ;;  %p1028_p6 = por %p61_p4, %p60_p3 }
  0x14   : > { %1550 = sst [smem:[#allocation20_spill]] %s1020_s18  ;;  %p84_p7 = scmp.eq.s32.totalorder %s1004_s13, 1 }
  0x15   : > { %p90_p8 = scmp.eq.s32.totalorder %s698_s14, 1  ;;  %p699_p9 = scmp.ge.s32.totalorder %s952_s12, 1 }
  0x16   : > { %p97_p10 = scmp.lt.s32.totalorder %s952_s12, 3  ;;  %p1035_p11 = por %p84_p7, %p54_p0 }
  0x17   : > { %p1039_p12 = por %p90_p8, %p60_p3  ;;  %s1558_s0 = sld [smem:[#allocation67_spill]] }
  0x18   : > { %s1553_s21 = scalar_select %p1035_p11, 1, 0 }
  0x19   : > { %s1555_s22 = scalar_select %p1039_p12, 1, 0 }
  0x1a   : > { %1554 = sst [smem:[#allocation21_spill]] %s1553_s21  ;;  %p1043_p13 = pnand %p699_p9, %p97_p10 }
  0x1b   : > { %1556 = sst [smem:[#allocation22_spill]] %s1555_s22 }
  0x1c   : > { %p797_p1 = pneg %p1043_p13 }
  0x1d   : > { %s865_s26 = scalar_lea.hbm %s1558_s0, 16 }
  0x1e   : > { %p798_p2 = pnand %p797_p1, %p61_p4  ;;  %p866_p0 = scmp.ne.s32.totalorder %s1558_s0, %s865_s26 }
  0x1f   : > { %p872_p9 = scmp.lt.u32.totalorder %s865_s26, %s1558_s0 }
  0x20   : > { %p867_p3 = pneg %p798_p2 }
  0x22   : > { %p868_p7 = pnand %p867_p3, %p866_p0 }
  0x24   : > { %p869_p8 = pneg %p868_p7 }
  0x26   : > { %p874_p10 = pnand %p872_p9, %p869_p8 }
  0x28   : > { %877 = shalt.err (!%p874_p10)
}
  0x29   : > { %s958_s3 = smov [#allocation2]   ;;  %p701_p1 = scmp.ge.s32.totalorder %s952_s12, 2 }
  0x2a   : > { %800 = dma.hbm_to_smem (!%p798_p2), %s1558_s0, 16, %s958_s3, [#allocation5]  }
  0x2b   : > { %115 = sbr.rel (%p701_p1) target bundleno = 64 (0x40), region = 20 }
  0x32   : > { %s119_s6 = sand.u32 1, %s948_s11   ;;  %s778_s8 = sshll.u32 %s952_s12, 9 }
  0x33   : > { %s780_s7 = smul.u32 224, %s119_s6  ;;  %s959_s14 = smov 1024  }
  0x34   : > { %785 = sst [smem:[#allocation9]] (%p1022_p5), %s959_s14  ;;  %s1559_s1 = sld [smem:[#allocation68_spill]] }
  0x35   : > { %s784_s16 = scalar_select %p1022_p5, [#allocation0], [#allocation10] }
  0x36   : > { %s123_s27 = scalar_lea.vmem [#allocation6], %s780_s7  ;;  %s960_s29 = smov 512  }
  0x37   : > { %s134_s26 = sld [smem:[%s784_s16]]   ;;  %s142_s28 = sshll.u32 %s123_s27, 4  ;;  %s143_s28 = int_to_ptr.vmem [resolvable:$true] %s142_s28 }
  0x38   : > { %786 = sst [smem:[#allocation9 + $0x1]] (%p1022_p5), %s960_s29  ;;  %s961_s30 = smov 4  }
  0x39   : > { %787 = sst [smem:[#allocation9 + $0x2]] (%p1022_p5), %s961_s30  ;;  %s962_s3 = smov 128  }
  0x3a   : > { %s129_s25 = scalar_lea.hbm %s1559_s1, %s778_s8  ;;  %788 = sst [smem:[#allocation9 + $0x3]] (%p1022_p5), %s962_s3 }
  0x3b   : > { %789 = sst [smem:[#allocation9 + $0x4]] (%p1022_p5), %s962_s3  ;;  %s963_s4 = smov 8  }
  0x3c   : > { %790 = sst [smem:[#allocation9 + $0x5]] (%p1022_p5), %s963_s4  ;;  %s120_s7 = scalar_lea.sflag [#allocation3], %s119_s6 }
  0x3d   : > { %s704_s5 = sshll.u32 %s134_s26, 26  ;;  %s964_s14 = smov [#allocation8]  }
  0x3e   : > { %s705_s8 = sadd.s32 134217728, %s704_s5 }
  0x3f   : > { %791 = dma.general (%p1022_p5), %s129_s25, 3584, %s143_s28, %s120_s7, %s964_s14, [#allocation9], %s705_s8, 0  }
  0x40 PF: > { %167 = sbr.rel (%p1043_p13) target bundleno = 269 (0x10d), region = 28 }
  0x47   : > { %927 = dma.done.wait (%p61_p4), [#allocation5], 16  }
  0x48   : > { %929 = vsyncadd (%p61_p4), [#allocation5], 4294967280  ;;  %s1094_s16 = sand.u32 1, %s944_s10  }
  0x49   : > { %1560 = sst [smem:[#allocation23_spill]] %s1094_s16  ;;  %s781_s6 = smul.u32 224, %s1094_s16 }
  0x4a   : > { %s174_s17 = scalar_lea.sflag [#allocation3], %s1094_s16 }
  0x4b   : > { %s1098_s19 = scalar_lea.vmem [#allocation6], %s781_s6 }
  0x4c   : > { %931 = dma.done.wait (%p1028_p6), %s174_s17, 3584  }
  0x4d   : > { %933 = vsyncadd (%p1028_p6), %s174_s17, 4294963712 }
  0x4e   : > { %182 = sfence }
  0x4f   : > { %s1105_s24 = sld [smem:[#allocation2]]  ;;  %s1107_s25 = sld [smem:[#allocation2 + $0x1]] }
  0x50   : > { %s1109_s26 = sld [smem:[#allocation2 + $0x2]]  ;;  %s1111_s27 = sld [smem:[#allocation2 + $0x3]] }
  0x51   : > { %s1113_s28 = sld [smem:[#allocation2 + $0x4]]  ;;  %s1115_s29 = sld [smem:[#allocation2 + $0x5]] }
  0x52   : > { %s1117_s30 = sld [smem:[#allocation2 + $0x6]]  ;;  %s1119_s3 = sld [smem:[#allocation2 + $0x7]] }
  0x53   : > { %s1121_s20 = sld [smem:[#allocation2 + $0x8]]  ;;  %s1123_s4 = sld [smem:[#allocation2 + $0x9]] }
  0x54   : > { %s1125_s5 = sld [smem:[#allocation2 + $0xa]]  ;;  %s1127_s8 = sld [smem:[#allocation2 + $0xb]] }
  0x55   : > { %s1129_s7 = sld [smem:[#allocation2 + $0xc]]  ;;  %s1131_s14 = sld [smem:[#allocation2 + $0xd]] }
  0x56   : > { %s1133_s6 = sld [smem:[#allocation2 + $0xe]]  ;;  %s1135_s17 = sld [smem:[#allocation2 + $0xf]] }
  0x57   : > { %s1137_s23 = sld [smem:[#allocation2 + $0x10]]  ;;  %s1139_s0 = sld [smem:[#allocation2 + $0x11]] }
  0x58   : > { %1561 = sst [smem:[#allocation24_spill]] %s1119_s3  ;;  %s1143_s18 = sld [smem:[#allocation2 + $0x13]] }
  0x59   : > { %1562 = sst [smem:[#allocation25_spill]] %s1123_s4  ;;  %s1141_s1 = sld [smem:[#allocation2 + $0x12]] }
  0x5a   : > { %1563 = sst [smem:[#allocation26_spill]] %s1125_s5  ;;  %s1147_s10 = sld [smem:[#allocation2 + $0x15]] }
  0x5b   : > { %1564 = sst [smem:[#allocation27_spill]] %s1127_s8  ;;  %s1145_s11 = sld [smem:[#allocation2 + $0x14]] }
  0x5c   : > { %1565 = sst [smem:[#allocation28_spill]] %s1129_s7  ;;  %s1151_s12 = sld [smem:[#allocation2 + $0x17]] }
  0x5d   : > { %1566 = sst [smem:[#allocation29_spill]] %s1133_s6  ;;  %s1149_s15 = sld [smem:[#allocation2 + $0x16]] }
  0x5e   : > { %1567 = sst [smem:[#allocation30_spill]] %s1137_s23  ;;  %s1155_s9 = sld [smem:[#allocation2 + $0x19]] }
  0x5f   : > { %1568 = sst [smem:[#allocation31_spill]] %s1139_s0  ;;  %s1153_s22 = sld [smem:[#allocation2 + $0x18]] }
  0x60   : > { %1569 = sst [smem:[#allocation32_spill]] %s1141_s1  ;;  %s1159_s21 = sld [smem:[#allocation2 + $0x1b]] }
  0x61   : > { %1570 = sst [smem:[#allocation33_spill]] %s1143_s18  ;;  %s1157_s2 = sld [smem:[#allocation2 + $0x1a]] }
  0x62   : > { %1571 = sst [smem:[#allocation34_spill]] %s1145_s11  ;;  %s1163_s1 = sld [smem:[#allocation2 + $0x1d]] }
  0x63   : > { %1572 = sst [smem:[#allocation35_spill]] %s1147_s10  ;;  %s1161_s13 = sld [smem:[#allocation2 + $0x1c]] }
  0x64   : > { %1573 = sst [smem:[#allocation36_spill]] %s1149_s15  ;;  %s1167_s11 = sld [smem:[#allocation2 + $0x1f]] }
  0x65   : > { %1574 = sst [smem:[#allocation37_spill]] %s1151_s12  ;;  %s1165_s18 = sld [smem:[#allocation2 + $0x1e]] }
  0x66   : > { %1575 = sst [smem:[#allocation38_spill]] %s1153_s22  ;;  %s1171_s15 = sld [smem:[#allocation2 + $0x21]] }
  0x67   : > { %1576 = sst [smem:[#allocation39_spill]] %s1155_s9  ;;  %s1169_s10 = sld [smem:[#allocation2 + $0x20]] }
  0x68   : > { %1577 = sst [smem:[#allocation40_spill]] %s1157_s2  ;;  %s1175_s22 = sld [smem:[#allocation2 + $0x23]] }
  0x69   : > { %1578 = sst [smem:[#allocation41_spill]] %s1159_s21  ;;  %s1173_s12 = sld [smem:[#allocation2 + $0x22]] }
  0x6a   : > { %1579 = sst [smem:[#allocation42_spill]] %s1161_s13  ;;  %s1179_s2 = sld [smem:[#allocation2 + $0x25]] }
  0x6b   : > { %1580 = sst [smem:[#allocation43_spill]] %s1163_s1  ;;  %s1177_s9 = sld [smem:[#allocation2 + $0x24]] }
  0x6c   : > { %1581 = sst [smem:[#allocation44_spill]] %s1165_s18  ;;  %s1183_s13 = sld [smem:[#allocation2 + $0x27]] }
  0x6d   : > { %1582 = sst [smem:[#allocation45_spill]] %s1167_s11  ;;  %s1181_s21 = sld [smem:[#allocation2 + $0x26]] }
  0x6e   : > { %1583 = sst [smem:[#allocation46_spill]] %s1169_s10  ;;  %s1187_s18 = sld [smem:[#allocation2 + $0x29]] }
  0x6f   : > { %1584 = sst [smem:[#allocation47_spill]] %s1171_s15  ;;  %s1185_s1 = sld [smem:[#allocation2 + $0x28]] }
  0x70   : > { %1585 = sst [smem:[#allocation48_spill]] %s1173_s12  ;;  %s1191_s10 = sld [smem:[#allocation2 + $0x2b]] }
  0x71   : > { %1586 = sst [smem:[#allocation49_spill]] %s1177_s9  ;;  %s1189_s11 = sld [smem:[#allocation2 + $0x2a]] }
  0x72   : > { %1587 = sst [smem:[#allocation50_spill]] %s1179_s2  ;;  %s1195_s12 = sld [smem:[#allocation2 + $0x2d]] }
  0x73   : > { %1588 = sst [smem:[#allocation51_spill]] %s1181_s21  ;;  %s1193_s15 = sld [smem:[#allocation2 + $0x2c]] }
  0x74   : > { %1589 = sst [smem:[#allocation52_spill]] %s1183_s13  ;;  %s1199_s2 = sld [smem:[#allocation2 + $0x2f]] }
  0x75   : > { %1590 = sst [smem:[#allocation53_spill]] %s1185_s1  ;;  %s1197_s0 = sld [smem:[#allocation2 + $0x2e]] }
  0x76   : > { %1591 = sst [smem:[#allocation54_spill]] %s1187_s18  ;;  %s1203_s13 = sld [smem:[#allocation2 + $0x31]] }
  0x77   : > { %1592 = sst [smem:[#allocation55_spill]] %s1189_s11  ;;  %s1201_s21 = sld [smem:[#allocation2 + $0x30]] }
  0x78   : > { %1593 = sst [smem:[#allocation56_spill]] %s1191_s10  ;;  %s1207_s18 = sld [smem:[#allocation2 + $0x33]] }
  0x79   : > { %1594 = sst [smem:[#allocation57_spill]] %s1193_s15  ;;  %s1205_s1 = sld [smem:[#allocation2 + $0x32]] }
  0x7a   : > { %1595 = sst [smem:[#allocation58_spill]] %s1195_s12  ;;  %s1211_s10 = sld [smem:[#allocation2 + $0x35]] }
  0x7b   : > { %1596 = sst [smem:[#allocation59_spill]] %s1197_s0  ;;  %s1209_s11 = sld [smem:[#allocation2 + $0x34]] }
  0x7c   : > { %1597 = sst [smem:[#allocation60_spill]] %s1199_s2  ;;  %s1215_s12 = sld [smem:[#allocation2 + $0x37]] }
  0x7d   : > { %1598 = sst [smem:[#allocation61_spill]] %s1201_s21  ;;  %s1213_s15 = sld [smem:[#allocation2 + $0x36]] }
  0x7e   : > { %1599 = sst [smem:[#allocation62_spill]] %s1203_s13  ;;  %s1219_s23 = sld [smem:[#allocation2 + $0x39]] }
  0x7f   : > { %1600 = sst [smem:[#allocation63_spill]] %s1205_s1  ;;  %s1217_s0 = sld [smem:[#allocation2 + $0x38]] }
  0x80   : > { %1601 = sst [smem:[#allocation64_spill]] %s1207_s18  ;;  %s1223_s21 = sld [smem:[#allocation2 + $0x3b]] }
  0x81   : > { %1602 = sst [smem:[#allocation65_spill]] %s1209_s11  ;;  %s1221_s2 = sld [smem:[#allocation2 + $0x3a]] }
  0x82   : > { %1603 = sst [smem:[#allocation66_spill]] %s1211_s10  ;;  %s1227_s1 = sld [smem:[#allocation2 + $0x3d]] }
  0x83   : > { %s1225_s13 = sld [smem:[#allocation2 + $0x3c]]  ;;  %s1604_s18 = sshll.u32 %s1094_s16, 5 }
  0x84   : > { %s1231_s11 = scalar_lea.vmem [#allocation7], %s1604_s18  ;;  %s1233_s10 = smov 0  }
  0x85 LB: >> { %s1605_s9 = sld [smem:[#allocation49_spill]]  ;;  %s1606_s3 = sld [smem:[#allocation24_spill]]  ;;  %v285_v0 = vstv %s1105_s24  ;;  %v288_v1 = vstv %s1107_s25  ;;  %v293_v2 = vstv %s1109_s26  ;;  %v298_v3 = vstv %s1111_s27  ;;  %s956_s10 = sphi %s1233_s10, %s268_s10  }
  0x86   : >> { %s1607_s4 = sld [smem:[#allocation25_spill]]  ;;  %s1608_s5 = sld [smem:[#allocation26_spill]]  ;;  %v303_v4 = vstv %s1113_s28  ;;  %v308_v5 = vstv %s1115_s29  ;;  %v313_v6 = vstv %s1117_s30  ;;  %v318_v7 = vstv %s1175_s22 }
  0x87   : >> { %s1609_s8 = sld [smem:[#allocation27_spill]]  ;;  %s1610_s7 = sld [smem:[#allocation28_spill]]  ;;  %v326_v9 = vstv %s1121_s20  ;;  %v351_v14 = vstv %s1131_s14 }
  0x88   : >> { %s1611_s6 = sld [smem:[#allocation29_spill]]  ;;  %s1539_s18 = sshll.u32 %s956_s10, 4 }
  0x89   : >> { %s1254_s16 = scalar_lea.vmem %s1098_s19, %s1539_s18 [#allocation6]  ;;  %s1613_s18 = sld [smem:[#allocation31_spill]] }
  0x8a   : >> { %v1261_v16 = vld [vmem:[%s1254_s16] sm:$0xff]  ;;  %v1264_v17 = vld [vmem:[%s1254_s16 + $0x8] sm:$0xff] }
  0x8b   : >> { %v323_v8 = vstv %s1606_s3  ;;  %v356_v15 = vstv %s1605_s9  ;;  %v1267_v18 = vld [vmem:[%s1254_s16 + $0x20] sm:$0xff]  ;;  %v1271_v20 = vld [vmem:[%s1254_s16 + $0x28] sm:$0xff]  ;;  %v286_v23 = vmul.f32 %v285_v0, %v1261_v16  ;;  %v287_v24 = vmul.f32 %v285_v0, %v1264_v17  ;;  %s1614_s3 = sld [smem:[#allocation32_spill]]  ;;  %s1641_s9 = sld [smem:[#allocation60_spill]] }
  0x8c   : >> { %v331_v10 = vstv %s1607_s4  ;;  %v336_v11 = vstv %s1608_s5  ;;  %v1274_v21 = vld [vmem:[%s1254_s16 + $0x40] sm:$0xff]  ;;  %v1277_v22 = vld [vmem:[%s1254_s16 + $0x48] sm:$0xff]  ;;  %v289_v25 = vmul.f32 %v288_v1, %v1267_v18  ;;  %v324_v26 = vmul.f32 %v323_v8, %v1261_v16  ;;  %s1616_s4 = sld [smem:[#allocation34_spill]] }
  0x8d   : >> { %v341_v12 = vstv %s1609_s8  ;;  %v346_v13 = vstv %s1610_s7  ;;  %v1284_v27 = vld [vmem:[%s1254_s16 + $0x60] sm:$0xff]  ;;  %v1287_v28 = vld [vmem:[%s1254_s16 + $0x68] sm:$0xff]  ;;  %v290_v30 = vmul.f32 %v288_v1, %v1271_v20  ;;  %v294_v31 = vmul.f32 %v293_v2, %v1274_v21  ;;  %s1617_s5 = sld [smem:[#allocation50_spill]]  ;;  %s1621_s7 = sld [smem:[#allocation38_spill]] }
  0x8e   : >> { %v361_v19 = vstv %s1611_s6  ;;  %v1290_v29 = vld [vmem:[%s1254_s16 + $0x80] sm:$0xff]  ;;  %v295_v32 = vmul.f32 %v293_v2, %v1277_v22  ;;  %v325_v33 = vmul.f32 %v323_v8, %v1264_v17  ;;  %v1297_v34 = vld [vmem:[%s1254_s16 + $0x88] sm:$0xff]  ;;  %v291_v37 = vadd.f32 %v289_v25, %v286_v23  ;;  %s1620_s6 = sld [smem:[#allocation37_spill]]  ;;  %s1628_s8 = sld [smem:[#allocation44_spill]] }
  0x8f   : >> { %v1300_v35 = vld [vmem:[%s1254_s16 + $0xa0] sm:$0xff]  ;;  %v1303_v36 = vld [vmem:[%s1254_s16 + $0xa8] sm:$0xff]  ;;  %v299_v38 = vmul.f32 %v298_v3, %v1284_v27  ;;  %v300_v39 = vmul.f32 %v298_v3, %v1287_v28  ;;  %v304_v40 = vmul.f32 %v303_v4, %v1290_v29  ;;  %v292_v43 = vadd.f32 %v290_v30, %v287_v24 }
  0x90   : >> { %v1309_v41 = vld [vmem:[%s1254_s16 + $0xc0] sm:$0xff]  ;;  %v1312_v42 = vld [vmem:[%s1254_s16 + $0xc8] sm:$0xff]  ;;  %v305_v44 = vmul.f32 %v303_v4, %v1297_v34  ;;  %v309_v45 = vmul.f32 %v308_v5, %v1300_v35  ;;  %v310_v46 = vmul.f32 %v308_v5, %v1303_v36  ;;  %v296_v47 = vadd.f32 %v294_v31, %v291_v37  ;;  %s1612_s16 = sld [smem:[#allocation30_spill]] }
  0x91   : >> { %v314_v48 = vmul.f32 %v313_v6, %v1309_v41  ;;  %v315_v49 = vmul.f32 %v313_v6, %v1312_v42  ;;  %v327_v50 = vmul.f32 %v326_v9, %v1267_v18  ;;  %v297_v51 = vadd.f32 %v295_v32, %v292_v43 }
  0x92   : >> { %v328_v52 = vmul.f32 %v326_v9, %v1271_v20  ;;  %v332_v53 = vmul.f32 %v331_v10, %v1274_v21  ;;  %v333_v54 = vmul.f32 %v331_v10, %v1277_v22  ;;  %v301_v55 = vadd.f32 %v299_v38, %v296_v47 }
  0x93   : >> { %v329_v56 = vadd.f32 %v327_v50, %v324_v26  ;;  %v337_v57 = vmul.f32 %v336_v11, %v1284_v27  ;;  %v338_v58 = vmul.f32 %v336_v11, %v1287_v28  ;;  %v302_v59 = vadd.f32 %v300_v39, %v297_v51 }
  0x94   : >> { %v330_v60 = vadd.f32 %v328_v52, %v325_v33  ;;  %v342_v61 = vmul.f32 %v341_v12, %v1290_v29  ;;  %v343_v62 = vmul.f32 %v341_v12, %v1297_v34  ;;  %v306_v63 = vadd.f32 %v304_v40, %v301_v55 }
  0x95   : >> { %v334_v0 = vadd.f32 %v332_v53, %v329_v56  ;;  %v347_v1 = vmul.f32 %v346_v13, %v1300_v35  ;;  %v348_v2 = vmul.f32 %v346_v13, %v1303_v36  ;;  %v307_v3 = vadd.f32 %v305_v44, %v302_v59 }
  0x96   : >> { %v335_v4 = vadd.f32 %v333_v54, %v330_v60  ;;  %v352_v5 = vmul.f32 %v351_v14, %v1309_v41  ;;  %v353_v6 = vmul.f32 %v351_v14, %v1312_v42  ;;  %v311_v8 = vadd.f32 %v309_v45, %v306_v63 }
  0x97   : >> { %v339_v9 = vadd.f32 %v337_v57, %v334_v0  ;;  %v362_v10 = vmul.f32 %v361_v19, %v1261_v16  ;;  %v363_v11 = vmul.f32 %v361_v19, %v1264_v17  ;;  %v312_v12 = vadd.f32 %v310_v46, %v307_v3 }
  0x98   : >> { %v340_v23 = vadd.f32 %v338_v58, %v335_v4  ;;  %v364_v24 = vstv %s1135_s17  ;;  %v369_v25 = vstv %s1612_s16  ;;  %v316_v13 = vadd.f32 %v314_v48, %v311_v8  ;;  %s1615_s16 = sld [smem:[#allocation33_spill]] }
  0x99   : >> { %v344_v26 = vadd.f32 %v342_v61, %v339_v9  ;;  %v365_v30 = vmul.f32 %v364_v24, %v1267_v18  ;;  %v366_v14 = vmul.f32 %v364_v24, %v1271_v20  ;;  %v317_v31 = vadd.f32 %v315_v49, %v312_v12 }
  0x9a   : >> { %v345_v32 = vadd.f32 %v343_v62, %v340_v23  ;;  %v370_v33 = vmul.f32 %v369_v25, %v1274_v21  ;;  %v371_v37 = vmul.f32 %v369_v25, %v1277_v22  ;;  %v319_v19 = vadd.f32 %v318_v7, %v316_v13 }
  0x9b   : >> { %v349_v38 = vadd.f32 %v347_v1, %v344_v26  ;;  %v367_v39 = vadd.f32 %v365_v30, %v362_v10  ;;  %v368_v40 = vadd.f32 %v366_v14, %v363_v11  ;;  %v320_v43 = vadd.f32 %v318_v7, %v317_v31 }
  0x9c   : >> { %v350_v44 = vadd.f32 %v348_v2, %v345_v32  ;;  %v374_v45 = vstv %s1613_s18  ;;  %v379_v46 = vstv %s1614_s3  ;;  %v1345_v47 = vmax.f32 %v319_v19, 0.0  ;;  %s1618_s3 = sld [smem:[#allocation35_spill]]  ;;  %s1619_s18 = sld [smem:[#allocation36_spill]] }
  0x9d   : >> { %v354_v48 = vadd.f32 %v352_v5, %v349_v38  ;;  %v372_v49 = vadd.f32 %v370_v33, %v367_v39  ;;  %v373_v50 = vadd.f32 %v371_v37, %v368_v40  ;;  %v1347_v51 = vmax.f32 %v320_v43, 0.0 }
  0x9e   : >> { %v355_v52 = vadd.f32 %v353_v6, %v350_v44  ;;  %v375_v53 = vmul.f32 %v374_v45, %v1284_v27  ;;  %v376_v54 = vmul.f32 %v374_v45, %v1287_v28  ;;  %v380_v55 = vmul.f32 %v379_v46, %v1290_v29 }
  0x9f   : >> { %v357_v7 = vadd.f32 %v356_v15, %v354_v48  ;;  %v381_v56 = vmul.f32 %v379_v46, %v1297_v34  ;;  %v384_v57 = vstv %s1615_s16  ;;  %v389_v0 = vstv %s1616_s4  ;;  %s1622_s16 = sld [smem:[#allocation39_spill]]  ;;  %s1623_s4 = sld [smem:[#allocation40_spill]] }
  0xa0   : >> { %v358_v58 = vadd.f32 %v356_v15, %v355_v52  ;;  %v377_v59 = vadd.f32 %v375_v53, %v372_v49  ;;  %v378_v60 = vadd.f32 %v376_v54, %v373_v50  ;;  %v385_v61 = vmul.f32 %v384_v57, %v1300_v35 }
  0xa1   : >> { %v1359_v62 = vmax.f32 %v357_v7, 0.0  ;;  %v386_v63 = vmul.f32 %v384_v57, %v1303_v36  ;;  %v394_v1 = vstv %s1617_s5  ;;  %v390_v5 = vmul.f32 %v389_v0, %v1309_v41  ;;  %s1624_s5 = sld [smem:[#allocation41_spill]] }
  0xa2   : >> { %v1364_v2 = vmax.f32 %v358_v58, 0.0  ;;  %v382_v3 = vadd.f32 %v380_v55, %v377_v59  ;;  %v383_v4 = vadd.f32 %v381_v56, %v378_v60  ;;  %v391_v15 = vmul.f32 %v389_v0, %v1312_v42 }
  0xa3   : >> { %v399_v6 = vstv %s1618_s3  ;;  %v402_v8 = vstv %s1619_s18  ;;  %v407_v9 = vstv %s1620_s6  ;;  %v412_v31 = vstv %s1621_s7  ;;  %s1625_s6 = sld [smem:[#allocation51_spill]]  ;;  %s1626_s3 = sld [smem:[#allocation42_spill]] }
  0xa4   : >> { %v387_v10 = vadd.f32 %v385_v61, %v382_v3  ;;  %v388_v11 = vadd.f32 %v386_v63, %v383_v4  ;;  %v400_v12 = vmul.f32 %v399_v6, %v1261_v16  ;;  %v401_v23 = vmul.f32 %v399_v6, %v1264_v17  ;;  %s1627_s18 = sld [smem:[#allocation43_spill]]  ;;  %s1629_s7 = sld [smem:[#allocation45_spill]] }
  0xa5   : >> { %v403_v24 = vmul.f32 %v402_v8, %v1267_v18  ;;  %v404_v25 = vmul.f32 %v402_v8, %v1271_v20  ;;  %v408_v13 = vmul.f32 %v407_v9, %v1274_v21  ;;  %v409_v26 = vmul.f32 %v407_v9, %v1277_v22 }
  0xa6   : >> { %v392_v30 = vadd.f32 %v390_v5, %v387_v10  ;;  %v393_v14 = vadd.f32 %v391_v15, %v388_v11  ;;  %v417_v32 = vstv %s1622_s16  ;;  %v413_v19 = vmul.f32 %v412_v31, %v1284_v27  ;;  %s1630_s16 = sld [smem:[#allocation46_spill]] }
  0xa7   : >> { %v405_v33 = vadd.f32 %v403_v24, %v400_v12  ;;  %v406_v37 = vadd.f32 %v404_v25, %v401_v23  ;;  %v414_v38 = vmul.f32 %v412_v31, %v1287_v28  ;;  %v418_v43 = vmul.f32 %v417_v32, %v1290_v29 }
  0xa8   : >> { %v395_v39 = vadd.f32 %v394_v1, %v392_v30  ;;  %v396_v40 = vadd.f32 %v394_v1, %v393_v14  ;;  %v419_v44 = vmul.f32 %v417_v32, %v1297_v34  ;;  %v422_v48 = vstv %s1623_s4  ;;  %s1631_s4 = sld [smem:[#allocation47_spill]] }
  0xa9   : >> { %v410_v45 = vadd.f32 %v408_v13, %v405_v33  ;;  %v411_v46 = vadd.f32 %v409_v26, %v406_v37  ;;  %v427_v49 = vstv %s1624_s5  ;;  %v423_v53 = vmul.f32 %v422_v48, %v1300_v35  ;;  %s1632_s5 = sld [smem:[#allocation48_spill]] }
  0xaa   : >> { %v1385_v50 = vmax.f32 %v395_v39, 0.0  ;;  %v1387_v52 = vmax.f32 %v396_v40, 0.0  ;;  %v424_v54 = vmul.f32 %v422_v48, %v1303_v36  ;;  %v428_v56 = vmul.f32 %v427_v49, %v1309_v41 }
  0xab   : >> { %v415_v7 = vadd.f32 %v413_v19, %v410_v45  ;;  %v416_v55 = vadd.f32 %v414_v38, %v411_v46  ;;  %v429_v57 = vmul.f32 %v427_v49, %v1312_v42  ;;  %v432_v58 = vstv %s1625_s6  ;;  %s1634_s6 = sld [smem:[#allocation53_spill]] }
  0xac   : >> { %v437_v59 = vstv %s1626_s3  ;;  %v440_v60 = vstv %s1627_s18  ;;  %v445_v61 = vstv %s1628_s8  ;;  %v450_v10 = vstv %s1629_s7  ;;  %s1633_s8 = sld [smem:[#allocation52_spill]]  ;;  %s1635_s3 = sld [smem:[#allocation54_spill]] }
  0xad   : >> { %v420_v63 = vadd.f32 %v418_v43, %v415_v7  ;;  %v421_v0 = vadd.f32 %v419_v44, %v416_v55  ;;  %v438_v1 = vmul.f32 %v437_v59, %v1261_v16  ;;  %v439_v3 = vmul.f32 %v437_v59, %v1264_v17  ;;  %s1636_s18 = sld [smem:[#allocation55_spill]]  ;;  %s1637_s7 = sld [smem:[#allocation56_spill]] }
  0xae   : >> { %v441_v4 = vmul.f32 %v440_v60, %v1267_v18  ;;  %v442_v5 = vmul.f32 %v440_v60, %v1271_v20  ;;  %v446_v15 = vmul.f32 %v445_v61, %v1274_v21  ;;  %v447_v6 = vmul.f32 %v445_v61, %v1277_v22 }
  0xaf   : >> { %v425_v8 = vadd.f32 %v423_v53, %v420_v63  ;;  %v426_v9 = vadd.f32 %v424_v54, %v421_v0  ;;  %v455_v11 = vstv %s1630_s16  ;;  %v451_v16 = vmul.f32 %v450_v10, %v1284_v27  ;;  %s1638_s16 = sld [smem:[#allocation57_spill]] }
  0xb0   : >> { %v443_v12 = vadd.f32 %v441_v4, %v438_v1  ;;  %v444_v23 = vadd.f32 %v442_v5, %v439_v3  ;;  %v452_v17 = vmul.f32 %v450_v10, %v1287_v28  ;;  %v456_v20 = vmul.f32 %v455_v11, %v1290_v29 }
  0xb1   : >> { %v430_v24 = vadd.f32 %v428_v56, %v425_v8  ;;  %v431_v18 = vadd.f32 %v429_v57, %v426_v9  ;;  %v457_v21 = vmul.f32 %v455_v11, %v1297_v34  ;;  %v460_v13 = vstv %s1631_s4  ;;  %s1639_s4 = sld [smem:[#allocation58_spill]] }
  0xb2   : >> { %v448_v22 = vadd.f32 %v446_v15, %v443_v12  ;;  %v449_v25 = vadd.f32 %v447_v6, %v444_v23  ;;  %v465_v26 = vstv %s1632_s5  ;;  %v461_v27 = vmul.f32 %v460_v13, %v1300_v35  ;;  %s1640_s5 = sld [smem:[#allocation59_spill]] }
  0xb3   : >> { %v433_v30 = vadd.f32 %v432_v58, %v430_v24  ;;  %v434_v14 = vadd.f32 %v432_v58, %v431_v18  ;;  %v462_v28 = vmul.f32 %v460_v13, %v1303_v36  ;;  %v466_v32 = vmul.f32 %v465_v26, %v1309_v41 }
  0xb4   : >> { %v453_v31 = vadd.f32 %v451_v16, %v448_v22  ;;  %v454_v29 = vadd.f32 %v452_v17, %v449_v25  ;;  %v467_v34 = vmul.f32 %v465_v26, %v1312_v42  ;;  %v470_v19 = vstv %s1633_s8  ;;  %s1642_s8 = sld [smem:[#allocation61_spill]] }
  0xb5   : >> { %v1415_v33 = vmax.f32 %v433_v30, 0.0  ;;  %v1417_v37 = vmax.f32 %v434_v14, 0.0  ;;  %v475_v38 = vstv %s1634_s6  ;;  %v478_v36 = vstv %s1635_s3  ;;  %s1643_s6 = sld [smem:[#allocation62_spill]]  ;;  %s1645_s3 = sld [smem:[#allocation64_spill]] }
  0xb6   : >> { %v458_v39 = vadd.f32 %v456_v20, %v453_v31  ;;  %v459_v40 = vadd.f32 %v457_v21, %v454_v29  ;;  %v476_v35 = vmul.f32 %v475_v38, %v1345_v47  ;;  %v477_v43 = vmul.f32 %v475_v38, %v1347_v51 }
  0xb7   : >> { %v483_v44 = vstv %s1636_s18  ;;  %v488_v45 = vstv %s1637_s7  ;;  %v493_v41 = vstv %s1638_s16  ;;  %v479_v48 = vmul.f32 %v478_v36, %v1359_v62  ;;  %s1646_s18 = sld [smem:[#allocation65_spill]]  ;;  %s1647_s7 = sld [smem:[#allocation66_spill]] }
  0xb8   : >> { %v463_v42 = vadd.f32 %v461_v27, %v458_v39  ;;  %v464_v46 = vadd.f32 %v462_v28, %v459_v40  ;;  %v480_v49 = vmul.f32 %v478_v36, %v1364_v2  ;;  %v484_v53 = vmul.f32 %v483_v44, %v1385_v50  ;;  %s1648_s16 = sshll.u32 %s956_s10, 4  ;;  %s268_s10 = sadd.s32 1, %s956_s10  }
  0xb9   : >> { %v485_v54 = vmul.f32 %v483_v44, %v1387_v52  ;;  %v489_v7 = vmul.f32 %v488_v45, %v1415_v33  ;;  %v490_v55 = vmul.f32 %v488_v45, %v1417_v37  ;;  %v481_v58 = vadd.f32 %v479_v48, %v476_v35  ;;  %p265_p4 = scmp.ge.s32.totalorder %s268_s10, 2  }
  0xba   : >> { %v468_v56 = vadd.f32 %v466_v32, %v463_v42  ;;  %v469_v57 = vadd.f32 %v467_v34, %v464_v46  ;;  %v482_v59 = vadd.f32 %v480_v49, %v477_v43  ;;  %v498_v60 = vstv %s1215_s12 }
  0xbb   : >> { %v503_v61 = vstv %s1639_s4  ;;  %v506_v63 = vstv %s1640_s5  ;;  %v511_v0 = vstv %s1641_s9  ;;  %v486_v4 = vadd.f32 %v484_v53, %v481_v58  ;;  %s1644_s9 = sld [smem:[#allocation63_spill]]  ;;  %s587_s4 = scalar_lea.vmem %s1231_s11, %s1648_s16 [#allocation7] }
  0xbc   : >> { %v471_v1 = vadd.f32 %v470_v19, %v468_v56  ;;  %v472_v3 = vadd.f32 %v470_v19, %v469_v57  ;;  %v487_v5 = vadd.f32 %v485_v54, %v482_v59  ;;  %v504_v15 = vmul.f32 %v503_v61, %v1345_v47  ;;  %s1649_s5 = sld [smem:[#allocation18_spill]] (%p265_p4) }
  0xbd   : >> { %v505_v6 = vmul.f32 %v503_v61, %v1347_v51  ;;  %v507_v8 = vmul.f32 %v506_v63, %v1359_v62  ;;  %v508_v9 = vmul.f32 %v506_v63, %v1364_v2  ;;  %v491_v12 = vadd.f32 %v489_v7, %v486_v4 }
  0xbe   : >> { %v473_v10 = vmax.f32 %v471_v1, 0.0  ;;  %v474_v11 = vmax.f32 %v472_v3, 0.0  ;;  %v492_v23 = vadd.f32 %v490_v55, %v487_v5  ;;  %v512_v24 = vmul.f32 %v511_v0, %v1385_v50 }
  0xbf   : >> { %v509_v16 = vadd.f32 %v507_v8, %v504_v15  ;;  %v510_v17 = vadd.f32 %v508_v9, %v505_v6  ;;  %v513_v18 = vmul.f32 %v511_v0, %v1387_v52  ;;  %v516_v22 = vstv %s1642_s8  ;;  %s1650_s8 = sld [smem:[#allocation23_spill]] (%p265_p4) }
  0xc0   : >> { %v494_v20 = vmul.f32 %v493_v41, %v473_v10  ;;  %v495_v21 = vmul.f32 %v493_v41, %v474_v11  ;;  %v521_v25 = vstv %s1643_s6  ;;  %v517_v30 = vmul.f32 %v516_v22, %v1415_v33 }
  0xc1   : >> { %v514_v13 = vadd.f32 %v512_v24, %v509_v16  ;;  %v515_v26 = vadd.f32 %v513_v18, %v510_v17  ;;  %v518_v14 = vmul.f32 %v516_v22, %v1417_v37  ;;  %v522_v31 = vmul.f32 %v521_v25, %v473_v10 }
  0xc2   : >> { %v496_v27 = vadd.f32 %v494_v20, %v491_v12  ;;  %v497_v28 = vadd.f32 %v495_v21, %v492_v23  ;;  %v523_v29 = vmul.f32 %v521_v25, %v474_v11  ;;  %v526_v19 = vstv %s1217_s0 }
  0xc3   : >> { %v519_v32 = vadd.f32 %v517_v30, %v514_v13  ;;  %v520_v34 = vadd.f32 %v518_v14, %v515_v26  ;;  %v531_v38 = vstv %s1644_s9  ;;  %v534_v45 = vstv %s1645_s3  ;;  %s779_s9 = sshll.u32 (%p265_p4), %s1649_s5, 9 }
  0xc4   : >> { %v499_v39 = vadd.f32 %v498_v60, %v496_v27  ;;  %v500_v40 = vadd.f32 %v498_v60, %v497_v28  ;;  %v532_v35 = vmul.f32 %v531_v38, %v1345_v47  ;;  %v533_v43 = vmul.f32 %v531_v38, %v1347_v51 }
  0xc5   : >> { %v524_v36 = vadd.f32 %v522_v31, %v519_v32  ;;  %v525_v44 = vadd.f32 %v523_v29, %v520_v34  ;;  %v539_v41 = vstv %s1646_s18  ;;  %v535_v48 = vmul.f32 %v534_v45, %v1359_v62  ;;  %s591_s10 = scalar_lea.sflag (%p265_p4), [#allocation4], %s1650_s8 }
  0xc6   : >> { %v501_v42 = vmax.f32 %v499_v39, 0.0  ;;  %v502_v46 = vmax.f32 %v500_v40, 0.0  ;;  %v536_v49 = vmul.f32 %v534_v45, %v1364_v2  ;;  %v540_v47 = vmul.f32 %v539_v41, %v1385_v50 }
  0xc7   : >> { %v527_v53 = vadd.f32 %v526_v19, %v524_v36  ;;  %v528_v54 = vadd.f32 %v526_v19, %v525_v44  ;;  %v541_v7 = vmul.f32 %v539_v41, %v1387_v52  ;;  %v537_v51 = vadd.f32 %v535_v48, %v532_v35 }
  0xc8   : >> { %v538_v55 = vadd.f32 %v536_v49, %v533_v43  ;;  %v544_v56 = vstv %s1647_s7  ;;  %v549_v57 = vstv %s1213_s15  ;;  %v559_v1 = vstv %s1221_s2  ;;  %s1652_s7 = sld [smem:[#allocation69_spill]] (%p265_p4) }
  0xc9   : >> { %v529_v58 = vmax.f32 %v527_v53, 0.0  ;;  %v530_v59 = vmax.f32 %v528_v54, 0.0  ;;  %v545_v60 = vmul.f32 %v544_v56, %v1415_v33  ;;  %v546_v62 = vmul.f32 %v544_v56, %v1417_v37 }
  0xca   : >> { %v542_v2 = vadd.f32 %v540_v47, %v537_v51  ;;  %v543_v61 = vadd.f32 %v541_v7, %v538_v55  ;;  %v550_v63 = vmul.f32 %v549_v57, %v473_v10  ;;  %v551_v0 = vmul.f32 %v549_v57, %v474_v11 }
  0xcb   : >> { %v562_v50 = vstv %s1223_s21  ;;  %v554_v4 = vstv %s1219_s23  ;;  %v560_v5 = vmul.f32 %v559_v1, %v501_v42  ;;  %v561_v15 = vmul.f32 %v559_v1, %v502_v46 }
  0xcc   : >> { %v547_v3 = vadd.f32 %v545_v60, %v542_v2  ;;  %v548_v52 = vadd.f32 %v546_v62, %v543_v61  ;;  %v563_v9 = vmul.f32 %v562_v50, %v529_v58  ;;  %v564_v12 = vmul.f32 %v562_v50, %v530_v59 }
  0xcd   : >> { %v567_v37 = vstv %s1225_s13  ;;  %v572_v20 = vstv %s1227_s1  ;;  %s965_s1 = smov (%p265_p4), [#allocation7]  }
  0xce   : >> { %v552_v6 = vadd.f32 %v550_v63, %v547_v3  ;;  %v553_v8 = vadd.f32 %v551_v0, %v548_v52  ;;  %v565_v24 = vadd.f32 %v563_v9, %v560_v5  ;;  %v566_v10 = vadd.f32 %v564_v12, %v561_v15  ;;  %s1476_s16 = scalar_lea.hbm (%p265_p4), %s1652_s7, %s779_s9  ;;  %s882_s2 = sshll.u32 (%p265_p4), %s965_s1, 4  ;;  %s883_s2 = int_to_ptr.vmem [resolvable:$false] %s882_s2 }
  0xcf   : > { %s884_s12 = scalar_lea.vmem (%p265_p4), %s883_s2, 1024 }
  0xd0   : >> { %v555_v33 = vadd.f32 %v554_v4, %v552_v6  ;;  %v556_v23 = vadd.f32 %v554_v4, %v553_v8 }
  0xd2   : >> { %v557_v16 = vmax.f32 %v555_v33, 0.0  ;;  %v558_v17 = vmax.f32 %v556_v23, 0.0 }
  0xd4   : >> { %v568_v11 = vmul.f32 %v567_v37, %v557_v16  ;;  %v569_v18 = vmul.f32 %v567_v37, %v558_v17 }
  0xd6   : >> { %v570_v21 = vadd.f32 %v568_v11, %v565_v24  ;;  %v571_v22 = vadd.f32 %v569_v18, %v566_v10 }
  0xd8   : >> { %v573_v25 = vadd.f32 %v572_v20, %v570_v21  ;;  %v574_v13 = vadd.f32 %v572_v20, %v571_v22 }
  0xda   : >> { %v771_v26 = vmul.f32 -1.442695, %v573_v25  ;;  %v772_v30 = vmul.f32 -1.442695, %v574_v13 }
  0xdc   : >> { %857 = vpow2.f32 %v771_v26 }
  0xdd   : >> { %859 = vpow2.f32 %v772_v30 }
  0xe6   : >> { %v858_v14 = vpop.eup %857 }
  0xe7   : >> { %v860_v27 = vpop.eup %859  ;;  %v581_v28 = vadd.f32 1.0, %v858_v14 }
  0xe8   : >> { %v582_v31 = vadd.f32 1.0, %v860_v27 }
  0xe9   : >> { %861 = vrcp.f32 %v581_v28 }
  0xea   : >> { %863 = vrcp.f32 %v582_v31 }
  0xef   : > { %267 = sbr.rel (!%p265_p4) target bundleno = 133 (0x85), region = 92 }
  0xf3   : >> { %v862_v29 = vpop.eup %861 }
  0xf4   : >> { %v864_v32 = vpop.eup %863  ;;  %588 = vst [vmem:[%s587_s4] sm:$0xff] %v862_v29 }
  0xf5   : >> { %589 = vst [vmem:[%s587_s4 + $0x8] sm:$0xff] %v864_v32  ;;  %s604_s4 = sshll.u32 (%p265_p4), %s1231_s11, 4  ;;  %s1479_s4 = int_to_ptr.vmem [resolvable:$true] %s604_s4 }
  0xf6   : > { %s878_s0 = scalar_lea.vmem %s1479_s4, 512  ;;  %p885_p2 = scmp.lt.s32.totalorder %s1479_s4, %s883_s2 }
  0xf7   : > { %p879_p5 = scmp.ne.s32.totalorder %s1479_s4, %s878_s0  ;;  %p886_p0 = scmp.lt.s32.totalorder %s884_s12, %s878_s0 }
  0xf9   : > { %p880_p6 = pnand %p879_p5, %p1035_p11  ;;  %p887_p3 = por %p886_p0, %p885_p2 }
  0xfb   : > { %p881_p13 = pneg %p880_p6 }
  0xfd   : > { %p888_p7 = pnand %p887_p3, %p881_p13 }
  0xff   : > { %891 = shalt.err (!%p888_p7)
}
 0x100   : > { %s892_s11 = scalar_lea.hbm %s1476_s16, 512  ;;  %s896_s21 = scalar_lea.hbm %s1652_s7, 1024 }
 0x101   : > { %p893_p8 = scmp.ne.s32.totalorder %s1476_s16, %s892_s11  ;;  %p897_p4 = scmp.lt.u32.totalorder %s1476_s16, %s1652_s7 }
 0x102   : > { %p898_p5 = scmp.lt.u32.totalorder %s896_s21, %s892_s11  ;;  %p900_p13 = scmp.lt.u32.totalorder %s892_s11, %s1476_s16 }
 0x103   : > { %p894_p9 = pnand %p893_p8, %p1035_p11 }
 0x104   : > { %p899_p6 = por %p898_p5, %p897_p4 }
 0x105   : > { %p895_p10 = pneg %p894_p9 }
 0x106   : > { %p901_p2 = por %p900_p13, %p899_p6 }
 0x108   : > { %p902_p0 = pnand %p901_p2, %p895_p10 }
 0x10a   : > { %905 = shalt.err (!%p902_p0)
}
 0x10b   : > { %s966_s23 = smov 128   ;;  %s967_s24 = smov 8  }
 0x10c   : > { %795 = dma.vmem_to_hbm [thread:$0]  (%p1035_p11), %s1479_s4, 512, %s1476_s16, %s591_s10, %s966_s23, %s966_s23, %s967_s24  }
 0x10d PF: > { %s1653_s25 = sld [smem:[#allocation14_spill]]  ;;  %p802_p3 = pnand %p701_p1, %p1039_p12 }
 0x113   : > { %s619_s28 = sand.u32 1, %s1653_s25  }
 0x114   : > { %s620_s29 = scalar_lea.sflag [#allocation4], %s619_s28 }
 0x115   : > { %935 = dma.done.wait (!%p802_p3), %s620_s29, 512  }
 0x116   : > { %937 = vsyncadd (!%p802_p3), %s620_s29, 4294966784  ;;  %s1656_s12 = sld [smem:[#allocation19_spill]]  ;;  %s1657_s9 = sld [smem:[#allocation15_spill]] }
 0x117   : > { %s1658_s10 = sld [smem:[#allocation16_spill]]  ;;  %s1659_s11 = sld [smem:[#allocation20_spill]] }
 0x11c   : > { %p16_p7 = scmp.ge.s32.totalorder %s1656_s12, 4  }
 0x11e   :  { %18 = sbr.rel (!%p16_p7) target bundleno = 10 (0xa), region = 103 }
 0x125   :  { %625 = vsyncpa [#allocation3], 1 }
 0x126   :  { %627 = vsyncpa [#allocation3 + $0x1], 1 }
 0x127   :  { %628 = vsyncpa [#allocation4], 1 }
 0x128   :  { %630 = vsyncpa [#allocation4 + $0x1], 1 }
 0x129   :  { %631 = vsyncpa [#allocation5], 1 }
 0x12a   :  { %633 = vsyncpa [#allocation5 + $0x1], 1 }

</bundles_post_ra>
